<compile_context>
chip_gen: v7x
topology: tpu7x:2x2x1
jax: 0.10.0
libtpu: 0.0.40
codegen_flags: <defaults>
</compile_context>

<pallas_src>
import jax
import jax.numpy as jnp
from jax.experimental import pallas as pl
from jax.experimental.pallas import tpu as pltpu


NEG_SLOPE = 0.01  # torch.nn.LeakyReLU default negative_slope

D_IN, D_H1, D_H2, D_OUT = 784, 512, 256, 1


def _round_up(n, m):
    return ((n + m - 1) // m) * m


def _leaky_relu(x):
    return jnp.where(x > 0, x, NEG_SLOPE * x)


def discriminator_kernel(x_ref, w1_ref, b1_ref, w2_ref, b2_ref, w3_ref, b3_ref,
                         o_ref):
    """Whole 3-layer MLP for one batch tile, all operands resident in VMEM.

    x_ref:  (TB, 784)  bf16      w1_ref: (784, 512) bf16   b1_ref: (1, 512) f32
    w2_ref: (512, 256) bf16      b2_ref: (1, 256) f32
    w3_ref: (1, 256)   bf16      b3_ref: (1, 1)   f32      o_ref:  (TB, 1) f32
    """
    x = x_ref[...]                                              # bf16 (TB, 784)

    # Layer 1: bf16 MXU matmul, f32 accumulate; bias + LeakyReLU in f32.
    h1 = jnp.dot(x, w1_ref[...], preferred_element_type=jnp.float32)
    h1 = _leaky_relu(h1 + b1_ref[...])
    h1 = h1.astype(jnp.bfloat16)                                # feed MXU in bf16

    # Layer 2
    h2 = jnp.dot(h1, w2_ref[...], preferred_element_type=jnp.float32)
    h2 = _leaky_relu(h2 + b2_ref[...])                          # f32 (TB, 256)

    # Layer 3: N=1, so skip the MXU — VPU multiply + lane (XLU) reduction.
    h3 = jnp.sum(h2 * w3_ref[...], axis=-1, keepdims=True) + b3_ref[...]

    # Sigmoid: exp on the EUP, reciprocal on the EUP (approx).
    e = jnp.exp(-h3)
    o_ref[...] = (pl.reciprocal(1.0 + e, approx=True)).astype(o_ref.dtype)


def discriminator_forward(x, params, *, batch_tile=256):
    """x: any shape whose trailing elements flatten to 784 per sample (NCHW ok)."""
    w1, b1, w2, b2, w3, b3 = params
    x2d = x.reshape(-1, D_IN).astype(jnp.bfloat16)   # torch: x.view(-1, 784)
    B = x2d.shape[0]

    # Tile selection: multiple of 8 (sublane), no larger than the padded batch.
    bt = min(batch_tile, _round_up(B, 8))
    bt = _round_up(bt, 8)
    B_pad = _round_up(B, bt)
    if B_pad != B:
        x2d = jnp.pad(x2d, ((0, B_pad - B), (0, 0)))

    grid = (B_pad // bt,)

    # Weights / biases: full-array blocks, same block for every grid step.
    def whole(shape):
        return pl.BlockSpec(shape, lambda i: (0, 0))

    out = pl.pallas_call(
        discriminator_kernel,
        out_shape=jax.ShapeDtypeStruct((B_pad, D_OUT), jnp.float32),
        grid_spec=pltpu.PrefetchScalarGridSpec(
            num_scalar_prefetch=0,
            grid=grid,
            in_specs=[
                pl.BlockSpec((bt, D_IN), lambda i: (i, 0)),  # x tile (bf16)
                whole((D_IN, D_H1)),    # W1^T (bf16)
                whole((1, D_H1)),       # b1   (f32)
                whole((D_H1, D_H2)),    # W2^T (bf16)
                whole((1, D_H2)),       # b2   (f32)
                whole((1, D_H2)),       # W3 row (bf16), lane-broadcast
                whole((1, D_OUT)),      # b3   (f32)
            ],
            out_specs=pl.BlockSpec((bt, D_OUT), lambda i: (i, 0)),
        ),
        compiler_params=pltpu.CompilerParams(
            # Batch axis is parallel -> megacore-shardable on v7x when grid >= 2.
            dimension_semantics=("parallel",)),
    )(x2d, w1, b1, w2, b2, w3, b3)
    return out[:B]


def init_params(key):
    """nn.Linear-style init. Matmul weights stored transposed (in,out) in bf16;
    the final layer's weight is kept as a (1,256) lane row; biases in f32."""
    k = jax.random.split(key, 6)

    def uni(kk, shape, fan_in):
        bound = float(fan_in) ** -0.5
        return jax.random.uniform(kk, shape, jnp.float32, minval=-bound,
                                  maxval=bound)

    w1 = uni(k[0], (D_IN, D_H1), D_IN).astype(jnp.bfloat16)    # W1^T
    b1 = uni(k[1], (1, D_H1), D_IN)
    w2 = uni(k[2], (D_H1, D_H2), D_H1).astype(jnp.bfloat16)    # W2^T
    b2 = uni(k[3], (1, D_H2), D_H1)
    w3 = uni(k[4], (1, D_H2), D_H2).astype(jnp.bfloat16)       # W3 (out,in)=(1,256)
    b3 = uni(k[5], (1, D_OUT), D_H2)
    return (w1, b1, w2, b2, w3, b3)


def reference_forward(x, params):
    """Pure-JAX reference with the same dtype scheme as the kernel."""
    w1, b1, w2, b2, w3, b3 = params
    h = x.reshape(-1, D_IN).astype(jnp.bfloat16)
    h1 = jnp.dot(h, w1, preferred_element_type=jnp.float32) + b1
    h1 = jnp.where(h1 > 0, h1, NEG_SLOPE * h1).astype(jnp.bfloat16)
    h2 = jnp.dot(h1, w2, preferred_element_type=jnp.float32) + b2
    h2 = jnp.where(h2 > 0, h2, NEG_SLOPE * h2)
    h3 = jnp.sum(h2 * w3, axis=-1, keepdims=True) + b3
    return jax.nn.sigmoid(h3)


if __name__ == "__main__":
    key = jax.random.PRNGKey(0)
    kp, kx1, kx2 = jax.random.split(key, 3)

    params = init_params(kp)

    # 1) Small MNIST-like NCHW batch whose size is NOT a tile multiple
    #    (exercises the padding path; single grid step).
    x1 = jax.random.normal(kx1, (10, 1, 28, 28), jnp.float32)
    out1 = jax.block_until_ready(discriminator_forward(x1, params))
    ref1 = reference_forward(x1, params)
    assert out1.shape == (10, 1), out1.shape
    assert jnp.allclose(out1, ref1, atol=2e-3, rtol=0), \
        f"max err {jnp.max(jnp.abs(out1 - ref1))}"

    # 2) Multi-step grid (small tile only to exercise the pipeline; real
    #    deployments should keep the default 256-row tile).
    x2 = jax.random.normal(kx2, (32, 1, 28, 28), jnp.float32)
    out2 = jax.block_until_ready(
        discriminator_forward(x2, params, batch_tile=8))
    ref2 = reference_forward(x2, params)
    assert out2.shape == (32, 1), out2.shape
    assert jnp.allclose(out2, ref2, atol=2e-3, rtol=0), \
        f"max err {jnp.max(jnp.abs(out2 - ref2))}"

    print("KERNEL_OK")
</pallas_src>

<mosaic_0001>
module attributes {stable_mosaic.version = 11 : i64} {
  func.func @discriminator_kernel(%arg0: i32, %arg1: memref<16x784xbf16, #tpu.memory_space<vmem>>, %arg2: memref<784x512xbf16, #tpu.memory_space<vmem>>, %arg3: memref<1x512xf32, #tpu.memory_space<vmem>>, %arg4: memref<512x256xbf16, #tpu.memory_space<vmem>>, %arg5: memref<1x256xf32, #tpu.memory_space<vmem>>, %arg6: memref<1x256xbf16, #tpu.memory_space<vmem>>, %arg7: memref<1x1xf32, #tpu.memory_space<vmem>>, %arg8: memref<16x1xf32, #tpu.memory_space<vmem>>) attributes {dimension_semantics = [#tpu.dimension_semantics<parallel>], iteration_bounds = array<i64: 1>, scalar_prefetch = 0 : i64, scratch_operands = 0 : i64, tpu.core_type = #tpu.core_type<tc>, window_params = [{transform_indices = @transform_0, window_bounds = array<i64: 16, 784>}, {pipeline_mode = #tpu.pipeline_mode<synchronous>, transform_indices = @transform_1, window_bounds = array<i64: 784, 512>}, {pipeline_mode = #tpu.pipeline_mode<synchronous>, transform_indices = @transform_2, window_bounds = array<i64: 1, 512>}, {pipeline_mode = #tpu.pipeline_mode<synchronous>, transform_indices = @transform_3, window_bounds = array<i64: 512, 256>}, {pipeline_mode = #tpu.pipeline_mode<synchronous>, transform_indices = @transform_4, window_bounds = array<i64: 1, 256>}, {pipeline_mode = #tpu.pipeline_mode<synchronous>, transform_indices = @transform_5, window_bounds = array<i64: 1, 256>}, {pipeline_mode = #tpu.pipeline_mode<synchronous>, transform_indices = @transform_6, window_bounds = array<i64: 1, 1>}, {transform_indices = @transform_7, window_bounds = array<i64: 16, 1>}]} {
    %c0 = arith.constant 0 : index
    %c0_0 = arith.constant 0 : index
    %0 = vector.load %arg1[%c0, %c0_0] : memref<16x784xbf16, #tpu.memory_space<vmem>>, vector<16x784xbf16>
    %c0_1 = arith.constant 0 : index
    %c0_2 = arith.constant 0 : index
    %1 = vector.load %arg2[%c0_1, %c0_2] : memref<784x512xbf16, #tpu.memory_space<vmem>>, vector<784x512xbf16>
    %cst = arith.constant dense<0.000000e+00> : vector<16x512xf32>
    %2 = tpu.matmul %0, %1, %cst {dimension_numbers = #tpu.dot_dimension_numbers<[1], [0], [0], [1], [0, 0, 1, 1], [], []>} : vector<16x784xbf16>, vector<784x512xbf16>, vector<16x512xf32> -> vector<16x512xf32>
    %c0_3 = arith.constant 0 : index
    %c0_4 = arith.constant 0 : index
    %3 = vector.load %arg3[%c0_3, %c0_4] : memref<1x512xf32, #tpu.memory_space<vmem>>, vector<1x512xf32>
    %4 = vector.broadcast %3 : vector<1x512xf32> to vector<16x512xf32>
    %5 = arith.addf %2, %4 : vector<16x512xf32>
    %cst_5 = arith.constant 0.000000e+00 : f32
    %6 = vector.broadcast %cst_5 : f32 to vector<16x512xf32>
    %7 = arith.cmpf ogt, %5, %6 : vector<16x512xf32>
    %cst_6 = arith.constant 0.00999999977 : f32
    %8 = vector.broadcast %cst_6 : f32 to vector<16x512xf32>
    %9 = arith.mulf %8, %5 : vector<16x512xf32>
    %10 = arith.select %7, %5, %9 : vector<16x512xi1>, vector<16x512xf32>
    %11 = arith.truncf %10 : vector<16x512xf32> to vector<16x512xbf16>
    %c0_7 = arith.constant 0 : index
    %c0_8 = arith.constant 0 : index
    %12 = vector.load %arg4[%c0_7, %c0_8] : memref<512x256xbf16, #tpu.memory_space<vmem>>, vector<512x256xbf16>
    %cst_9 = arith.constant dense<0.000000e+00> : vector<16x256xf32>
    %13 = tpu.matmul %11, %12, %cst_9 {dimension_numbers = #tpu.dot_dimension_numbers<[1], [0], [0], [1], [0, 0, 1, 1], [], []>} : vector<16x512xbf16>, vector<512x256xbf16>, vector<16x256xf32> -> vector<16x256xf32>
    %c0_10 = arith.constant 0 : index
    %c0_11 = arith.constant 0 : index
    %14 = vector.load %arg5[%c0_10, %c0_11] : memref<1x256xf32, #tpu.memory_space<vmem>>, vector<1x256xf32>
    %15 = vector.broadcast %14 : vector<1x256xf32> to vector<16x256xf32>
    %16 = arith.addf %13, %15 : vector<16x256xf32>
    %cst_12 = arith.constant 0.000000e+00 : f32
    %17 = vector.broadcast %cst_12 : f32 to vector<16x256xf32>
    %18 = arith.cmpf ogt, %16, %17 : vector<16x256xf32>
    %cst_13 = arith.constant 0.00999999977 : f32
    %19 = vector.broadcast %cst_13 : f32 to vector<16x256xf32>
    %20 = arith.mulf %19, %16 : vector<16x256xf32>
    %21 = arith.select %18, %16, %20 : vector<16x256xi1>, vector<16x256xf32>
    %c0_14 = arith.constant 0 : index
    %c0_15 = arith.constant 0 : index
    %22 = vector.load %arg6[%c0_14, %c0_15] : memref<1x256xbf16, #tpu.memory_space<vmem>>, vector<1x256xbf16>
    %23 = arith.extf %22 : vector<1x256xbf16> to vector<1x256xf32>
    %24 = vector.broadcast %23 : vector<1x256xf32> to vector<16x256xf32>
    %25 = arith.mulf %21, %24 : vector<16x256xf32>
    %cst_16 = arith.constant dense<0.000000e+00> : vector<16xf32>
    %26 = vector.multi_reduction <add>, %25, %cst_16 [1] : vector<16x256xf32> to vector<16xf32>
    %27 = vector.shape_cast %26 : vector<16xf32> to vector<16x1xf32>
    %c0_17 = arith.constant 0 : index
    %c0_18 = arith.constant 0 : index
    %28 = vector.load %arg7[%c0_17, %c0_18] : memref<1x1xf32, #tpu.memory_space<vmem>>, vector<1x1xf32>
    %29 = vector.broadcast %28 : vector<1x1xf32> to vector<16x1xf32>
    %30 = arith.addf %27, %29 : vector<16x1xf32>
    %cst_19 = arith.constant 0.000000e+00 : f32
    %31 = vector.broadcast %cst_19 : f32 to vector<16x1xf32>
    %32 = arith.subf %31, %30 : vector<16x1xf32>
    %33 = math.exp %32 : vector<16x1xf32>
    %cst_20 = arith.constant 1.000000e+00 : f32
    %34 = vector.broadcast %cst_20 : f32 to vector<16x1xf32>
    %35 = arith.addf %34, %33 : vector<16x1xf32>
    %36 = tpu.reciprocal %35 {approx = true} : vector<16x1xf32> -> vector<16x1xf32>
    %c0_21 = arith.constant 0 : index
    %c0_22 = arith.constant 0 : index
    %37 = vector.load %arg8[%c0_21, %c0_22] : memref<16x1xf32, #tpu.memory_space<vmem>>, vector<16x1xf32>
    tpu.vector_store %arg8[%c0_21, %c0_22], %36 {strides = array<i32>} : memref<16x1xf32, #tpu.memory_space<vmem>>, vector<16x1xf32>,
    return
  }
  func.func @transform_0(%arg0: i32) -> (i32, i32) {
    %c0_i32 = arith.constant 0 : i32
    %c0_i32_0 = arith.constant 0 : i32
    return %arg0, %c0_i32 : i32, i32
  }
  func.func @transform_1(%arg0: i32) -> (i32, i32) {
    %c0_i32 = arith.constant 0 : i32
    %c0_i32_0 = arith.constant 0 : i32
    %c0_i32_1 = arith.constant 0 : i32
    return %c0_i32, %c0_i32_0 : i32, i32
  }
  func.func @transform_2(%arg0: i32) -> (i32, i32) {
    %c0_i32 = arith.constant 0 : i32
    %c0_i32_0 = arith.constant 0 : i32
    %c0_i32_1 = arith.constant 0 : i32
    return %c0_i32, %c0_i32_0 : i32, i32
  }
  func.func @transform_3(%arg0: i32) -> (i32, i32) {
    %c0_i32 = arith.constant 0 : i32
    %c0_i32_0 = arith.constant 0 : i32
    %c0_i32_1 = arith.constant 0 : i32
    return %c0_i32, %c0_i32_0 : i32, i32
  }
  func.func @transform_4(%arg0: i32) -> (i32, i32) {
    %c0_i32 = arith.constant 0 : i32
    %c0_i32_0 = arith.constant 0 : i32
    %c0_i32_1 = arith.constant 0 : i32
    return %c0_i32, %c0_i32_0 : i32, i32
  }
  func.func @transform_5(%arg0: i32) -> (i32, i32) {
    %c0_i32 = arith.constant 0 : i32
    %c0_i32_0 = arith.constant 0 : i32
    %c0_i32_1 = arith.constant 0 : i32
    return %c0_i32, %c0_i32_0 : i32, i32
  }
  func.func @transform_6(%arg0: i32) -> (i32, i32) {
    %c0_i32 = arith.constant 0 : i32
    %c0_i32_0 = arith.constant 0 : i32
    %c0_i32_1 = arith.constant 0 : i32
    return %c0_i32, %c0_i32_0 : i32, i32
  }
  func.func @transform_7(%arg0: i32) -> (i32, i32) {
    %c0_i32 = arith.constant 0 : i32
    %c0_i32_0 = arith.constant 0 : i32
    return %arg0, %c0_i32 : i32, i32
  }
}

</mosaic_0001>

<bundles_post_ra>
// kernel: tpu_custom_call.1
= control target key start
LH: loop header
LB: loop body
LE: loop exit
PB: predicated region body
PF: predicated region fallthrough
CT: control target
= control target key end

     0   :  { %s3193_s0 = inlined_call_operand.hbm [shape: bf16[16,784], index: 0, kind: input, shape index: {}]   ;;  %s3194_s1 = inlined_call_operand.hbm [shape: bf16[784,512], index: 1, kind: input, shape index: {}]   ;;  %s3195_s2 = inlined_call_operand.vmem [shape: f32[1,512], index: 2, kind: input, shape index: {}]   ;;  %s3196_s3 = inlined_call_operand.hbm [shape: bf16[512,256], index: 3, kind: input, shape index: {}]   ;;  %s3197_s4 = inlined_call_operand.vmem [shape: f32[1,256], index: 4, kind: input, shape index: {}]   ;;  %s3198_s5 = inlined_call_operand.vmem [shape: bf16[1,256], index: 5, kind: input, shape index: {}]   ;;  %s3199_s6 = inlined_call_operand.<no memory space> [shape: f32[1,1], index: 6, kind: input, shape index: {}]   ;;  %s3200_s7 = inlined_call_operand.vmem [shape: f32[16,1], index: 7, kind: output, shape index: {}]  }
   0x1   :  { %v12_v0 = vstv %s3199_s6 }
   0x2   :  { %13 = vst [vmem:[#allocation2] sm:$0x1] %v12_v0 }
   0x3   :  { %14 = vsyncpa [#allocation4], 0 }
   0x4   :  { %15 = vsyncpa [#allocation6], 0  ;;  %s3038_s26 = smov [#allocation5]   ;;  %s2968_s30 = scalar_lea.hbm %s3194_s1, 25088 }
   0x5   :  { %s33_s27 = sshll.u32 %s3038_s26, 4  ;;  %p2969_p0 = scmp.ne.s32.totalorder %s3194_s1, %s2968_s30  ;;  %s34_s27 = int_to_ptr.vmem [resolvable:$true] %s33_s27 }
   0x6   :  { %p2972_p1 = scmp.lt.u32.totalorder %s2968_s30, %s3194_s1 }
   0x8   :  { %p2974_p2 = pnand %p2972_p1, %p2969_p0 }
   0xa   :  { %2977 = shalt.err (!%p2974_p2)
}
   0xb   :  { %s2978_s6 = scalar_lea.vmem %s34_s27, 25088  ;;  %p2983_p4 = scmp.lt.s32.totalorder %s34_s27, %s34_s27 }
   0xc   :  { %p2979_p3 = scmp.ne.s32.totalorder %s34_s27, %s2978_s6  ;;  %p2984_p5 = scmp.lt.s32.totalorder %s2978_s6, %s2978_s6 }
   0xe   :  { %p2985_p6 = por %p2984_p5, %p2983_p4 }
  0x10   :  { %p2986_p7 = pnand %p2985_p6, %p2979_p3 }
  0x12   :  { %2989 = shalt.err (!%p2986_p7)
}
  0x13   :  { %s3039_s12 = smov 256   ;;  %s3040_s13 = smov 16  }
  0x14   :  { %39 = dma.hbm_to_vmem [thread:$0]  %s3194_s1, 25088, %s34_s27, [#allocation6], %s3039_s12, %s3039_s12, %s3040_s13  }
  0x15   :  { %s3041_s16 = smov [#allocation3]   ;;  %s2990_s20 = scalar_lea.hbm %s3193_s0, 896 }
  0x16   :  { %s21_s17 = sshll.u32 %s3041_s16, 4  ;;  %p2991_p8 = scmp.ne.s32.totalorder %s3193_s0, %s2990_s20  ;;  %s22_s17 = int_to_ptr.vmem [resolvable:$true] %s21_s17 }
  0x17   :  { %p2994_p9 = scmp.lt.u32.totalorder %s2990_s20, %s3193_s0 }
  0x19   :  { %p2996_p10 = pnand %p2994_p9, %p2991_p8 }
  0x1b   :  { %2999 = shalt.err (!%p2996_p10)
}
  0x1c   :  { %s3000_s25 = scalar_lea.vmem %s22_s17, 896  ;;  %p3005_p12 = scmp.lt.s32.totalorder %s22_s17, %s22_s17 }
  0x1d   :  { %p3001_p11 = scmp.ne.s32.totalorder %s22_s17, %s3000_s25  ;;  %p3006_p13 = scmp.lt.s32.totalorder %s3000_s25, %s3000_s25 }
  0x1f   :  { %p3007_p0 = por %p3006_p13, %p3005_p12 }
  0x21   :  { %p3008_p1 = pnand %p3007_p0, %p3001_p11 }
  0x23   :  { %3011 = shalt.err (!%p3008_p1)
}
  0x24   :  { %s3042_s1 = smov 448   ;;  %s3043_s26 = smov 28  }
  0x25   :  { %27 = dma.hbm_to_vmem [thread:$0]  %s3193_s0, 896, %s22_s17, [#allocation4], %s3042_s1, %s3042_s1, %s3043_s26  }
  0x26   :  { %s3044_s29 = smov [#allocation7]   ;;  %s3012_s10 = scalar_lea.hbm %s3196_s3, 8192 }
  0x27   :  { %s47_s30 = sshll.u32 %s3044_s29, 4  ;;  %p3013_p2 = scmp.ne.s32.totalorder %s3196_s3, %s3012_s10  ;;  %s48_s30 = int_to_ptr.vmem [resolvable:$true] %s47_s30 }
  0x28   :  { %p3016_p3 = scmp.lt.u32.totalorder %s3012_s10, %s3196_s3 }
  0x2a   :  { %p3018_p4 = pnand %p3016_p3, %p3013_p2 }
  0x2c   :  { %3021 = shalt.err (!%p3018_p4)
}
  0x2d   :  { %s3022_s14 = scalar_lea.vmem %s48_s30, 8192  ;;  %p3027_p6 = scmp.lt.s32.totalorder %s48_s30, %s48_s30 }
  0x2e   :  { %p3023_p5 = scmp.ne.s32.totalorder %s48_s30, %s3022_s14  ;;  %p3028_p7 = scmp.lt.s32.totalorder %s3022_s14, %s3022_s14 }
  0x30   :  { %p3029_p8 = por %p3028_p7, %p3027_p6 }
  0x32   :  { %p3030_p9 = pnand %p3029_p8, %p3023_p5 }
  0x34   :  { %3033 = shalt.err (!%p3030_p9)
}
  0x35   :  { %s3045_s0 = smov 128   ;;  %s3046_s15 = smov 8  }
  0x36   :  { %53 = dma.hbm_to_vmem [thread:$0]  %s3196_s3, 8192, %s48_s30, [#allocation6], %s3045_s0, %s3045_s0, %s3046_s15  }
  0x37   :  { %3034 = dma.done.wait [#allocation4], 896  }
  0x38   :  { %3035 = vsyncadd [#allocation4], 4294966400 }
  0x39   :  { %3036 = dma.done.wait [#allocation6], 33280  }
  0x3a   :  { %3037 = vsyncadd [#allocation6], 4294934016  ;;  %v2560_v1 = vld [vmem:[#allocation5 + $0x4] ss:$16 sps:$4 sm:$0xff]   ;;  %v2564_v3 = vld [vmem:[#allocation5] ss:$16 sps:$4 sm:$0xff]  }
  0x3b   :  { %v2562_v2 = vld [vmem:[#allocation5 + $0x204] ss:$16 sps:$4 sm:$0xff]   ;;  %1315 = vmatprep.subr.bf16.mxu1 %v2560_v1  ;;  %v2565_v4 = vld [vmem:[#allocation5 + $0x200] ss:$16 sps:$4 sm:$0xff]   ;;  %v2658_v50 = vld [vmem:[#allocation3 + $0x4] ss:$28 sps:$4 sm:$0xff]  }
  0x3c   :  { %1358 = vmatprep.subr.bf16.mxu0 %v2562_v2  ;;  %v2566_v5 = vld [vmem:[#allocation5 + $0x24] ss:$16 sps:$4 sm:$0xff]   ;;  %1316 = vmatpush1.bf16.msra.mxu1 %v2564_v3  ;;  %v2570_v7 = vld [vmem:[#allocation5 + $0x20] ss:$16 sps:$4 sm:$0xff]   ;;  %vm1311_vm0 = vcmask 130048   ;;  %vm2231_vm13 = vcmask 7168  }
  0x3d   :  { %1359 = vmatpush1.bf16.msra.mxu0 %v2565_v4  ;;  %v2568_v6 = vld [vmem:[#allocation5 + $0x224] ss:$16 sps:$4 sm:$0xff]   ;;  %1317 = vmatprep.subr.bf16.mxu1 %v2566_v5  ;;  %v2571_v8 = vld [vmem:[#allocation5 + $0x220] ss:$16 sps:$4 sm:$0xff]   ;;  %v2667_v4 = vld [vmem:[#allocation5 + $0xc] ss:$16 sps:$4 sm:$0xff]  }
  0x3e   :  { %1360 = vmatprep.subr.bf16.mxu0 %v2568_v6  ;;  %v2572_v9 = vld [vmem:[#allocation5 + $0x44] ss:$16 sps:$4 sm:$0xff]   ;;  %v2576_v11 = vld [vmem:[#allocation5 + $0x40] ss:$16 sps:$4 sm:$0xff]   ;;  %1347 = vmatprep.mubr.bf16.mxu1 %v2658_v50 }
  0x3f   :  { %v2574_v10 = vld [vmem:[#allocation5 + $0x244] ss:$16 sps:$4 sm:$0xff]   ;;  %v2577_v12 = vld [vmem:[#allocation5 + $0x240] ss:$16 sps:$4 sm:$0xff]  }
  0x40   :  { %1318 = vmatpush1.bf16.msra.mxu1 %v2570_v7  ;;  %v2578_v13 = vld [vmem:[#allocation5 + $0x64] ss:$16 sps:$4 sm:$0xff]   ;;  %v2582_v15 = vld [vmem:[#allocation5 + $0x60] ss:$16 sps:$4 sm:$0xff]  }
  0x41   :  { %1361 = vmatpush1.bf16.msra.mxu0 %v2571_v8  ;;  %1319 = vmatprep.subr.bf16.mxu1 %v2572_v9  ;;  %v2580_v14 = vld [vmem:[#allocation5 + $0x264] ss:$16 sps:$4 sm:$0xff]   ;;  %v2583_v16 = vld [vmem:[#allocation5 + $0x260] ss:$16 sps:$4 sm:$0xff]   ;;  %v2665_v8 = vld [vmem:[#allocation5 + $0x8] ss:$16 sps:$4 sm:$0xff]  }
  0x42   :  { %1362 = vmatprep.subr.bf16.mxu0 %v2574_v10  ;;  %v2584_v17 = vld [vmem:[#allocation5 + $0x84] ss:$16 sps:$4 sm:$0xff]   ;;  %v2588_v19 = vld [vmem:[#allocation5 + $0x80] ss:$16 sps:$4 sm:$0xff]   ;;  %v2673_v10 = vld [vmem:[#allocation5 + $0x2c] ss:$16 sps:$4 sm:$0xff]  }
  0x43   :  { %v2586_v18 = vld [vmem:[#allocation5 + $0x284] ss:$16 sps:$4 sm:$0xff]   ;;  %v2589_v20 = vld [vmem:[#allocation5 + $0x280] ss:$16 sps:$4 sm:$0xff]  }
  0x44   :  { %1320 = vmatpush1.bf16.msra.mxu1 %v2576_v11  ;;  %v2590_v21 = vld [vmem:[#allocation5 + $0xa4] ss:$16 sps:$4 sm:$0xff]   ;;  %v2594_v23 = vld [vmem:[#allocation5 + $0xa0] ss:$16 sps:$4 sm:$0xff]  }
  0x45   :  { %1363 = vmatpush1.bf16.msra.mxu0 %v2577_v12  ;;  %1321 = vmatprep.subr.bf16.mxu1 %v2578_v13  ;;  %v2592_v22 = vld [vmem:[#allocation5 + $0x2a4] ss:$16 sps:$4 sm:$0xff]   ;;  %v2595_v24 = vld [vmem:[#allocation5 + $0x2a0] ss:$16 sps:$4 sm:$0xff]   ;;  %v2671_v12 = vld [vmem:[#allocation5 + $0x28] ss:$16 sps:$4 sm:$0xff]  }
  0x46   :  { %1364 = vmatprep.subr.bf16.mxu0 %v2580_v14  ;;  %v2596_v25 = vld [vmem:[#allocation5 + $0xc4] ss:$16 sps:$4 sm:$0xff]   ;;  %v2600_v27 = vld [vmem:[#allocation5 + $0xc0] ss:$16 sps:$4 sm:$0xff]   ;;  %v2679_v14 = vld [vmem:[#allocation5 + $0x4c] ss:$16 sps:$4 sm:$0xff]  }
  0x47   :  { %v2598_v26 = vld [vmem:[#allocation5 + $0x2c4] ss:$16 sps:$4 sm:$0xff]   ;;  %v2601_v28 = vld [vmem:[#allocation5 + $0x2c0] ss:$16 sps:$4 sm:$0xff]  }
  0x48   :  { %1322 = vmatpush1.bf16.msra.mxu1 %v2582_v15  ;;  %v2602_v29 = vld [vmem:[#allocation5 + $0xe4] ss:$16 sps:$4 sm:$0xff]   ;;  %v2606_v31 = vld [vmem:[#allocation5 + $0xe0] ss:$16 sps:$4 sm:$0xff]  }
  0x49   :  { %1365 = vmatpush1.bf16.msra.mxu0 %v2583_v16  ;;  %1323 = vmatprep.subr.bf16.mxu1 %v2584_v17  ;;  %v2604_v30 = vld [vmem:[#allocation5 + $0x2e4] ss:$16 sps:$4 sm:$0xff]   ;;  %v2607_v32 = vld [vmem:[#allocation5 + $0x2e0] ss:$16 sps:$4 sm:$0xff]   ;;  %v2677_v16 = vld [vmem:[#allocation5 + $0x48] ss:$16 sps:$4 sm:$0xff]  }
  0x4a   :  { %1366 = vmatprep.subr.bf16.mxu0 %v2586_v18  ;;  %v2608_v33 = vld [vmem:[#allocation5 + $0x104] ss:$16 sps:$4 sm:$0xff]   ;;  %v2612_v35 = vld [vmem:[#allocation5 + $0x100] ss:$16 sps:$4 sm:$0xff]   ;;  %v2685_v18 = vld [vmem:[#allocation5 + $0x6c] ss:$16 sps:$4 sm:$0xff]  }
  0x4b   :  { %v2610_v34 = vld [vmem:[#allocation5 + $0x304] ss:$16 sps:$4 sm:$0xff]   ;;  %v2613_v36 = vld [vmem:[#allocation5 + $0x300] ss:$16 sps:$4 sm:$0xff]  }
  0x4c   :  { %1324 = vmatpush1.bf16.msra.mxu1 %v2588_v19  ;;  %v2614_v37 = vld [vmem:[#allocation5 + $0x124] ss:$16 sps:$4 sm:$0xff]   ;;  %v2618_v39 = vld [vmem:[#allocation5 + $0x120] ss:$16 sps:$4 sm:$0xff]  }
  0x4d   :  { %1367 = vmatpush1.bf16.msra.mxu0 %v2589_v20  ;;  %1325 = vmatprep.subr.bf16.mxu1 %v2590_v21  ;;  %v2616_v38 = vld [vmem:[#allocation5 + $0x324] ss:$16 sps:$4 sm:$0xff]   ;;  %v2619_v40 = vld [vmem:[#allocation5 + $0x320] ss:$16 sps:$4 sm:$0xff]   ;;  %v2683_v20 = vld [vmem:[#allocation5 + $0x68] ss:$16 sps:$4 sm:$0xff]  }
  0x4e   :  { %1368 = vmatprep.subr.bf16.mxu0 %v2592_v22  ;;  %v2620_v41 = vld [vmem:[#allocation5 + $0x144] ss:$16 sps:$4 sm:$0xff]   ;;  %v2624_v43 = vld [vmem:[#allocation5 + $0x140] ss:$16 sps:$4 sm:$0xff]   ;;  %v2691_v22 = vld [vmem:[#allocation5 + $0x8c] ss:$16 sps:$4 sm:$0xff]  }
  0x4f   :  { %v2622_v42 = vld [vmem:[#allocation5 + $0x344] ss:$16 sps:$4 sm:$0xff]   ;;  %v2625_v44 = vld [vmem:[#allocation5 + $0x340] ss:$16 sps:$4 sm:$0xff]  }
  0x50   :  { %1326 = vmatpush1.bf16.msra.mxu1 %v2594_v23  ;;  %v2626_v45 = vld [vmem:[#allocation5 + $0x164] ss:$16 sps:$4 sm:$0xff]   ;;  %v2630_v47 = vld [vmem:[#allocation5 + $0x160] ss:$16 sps:$4 sm:$0xff]  }
  0x51   :  { %1369 = vmatpush1.bf16.msra.mxu0 %v2595_v24  ;;  %1327 = vmatprep.subr.bf16.mxu1 %v2596_v25  ;;  %v2628_v46 = vld [vmem:[#allocation5 + $0x364] ss:$16 sps:$4 sm:$0xff]   ;;  %v2631_v48 = vld [vmem:[#allocation5 + $0x360] ss:$16 sps:$4 sm:$0xff]   ;;  %v2689_v24 = vld [vmem:[#allocation5 + $0x88] ss:$16 sps:$4 sm:$0xff]  }
  0x52   :  { %1370 = vmatprep.subr.bf16.mxu0 %v2598_v26  ;;  %v2632_v49 = vld [vmem:[#allocation5 + $0x184] ss:$16 sps:$4 sm:$0xff]   ;;  %v2636_v53 = vld [vmem:[#allocation5 + $0x180] ss:$16 sps:$4 sm:$0xff]   ;;  %v2697_v26 = vld [vmem:[#allocation5 + $0xac] ss:$16 sps:$4 sm:$0xff]  }
  0x53   :  { %v2634_v51 = vld [vmem:[#allocation5 + $0x384] ss:$16 sps:$4 sm:$0xff]   ;;  %v2637_v54 = vld [vmem:[#allocation5 + $0x380] ss:$16 sps:$4 sm:$0xff]  }
  0x54   :  { %1328 = vmatpush1.bf16.msra.mxu1 %v2600_v27  ;;  %v3127_v52 = vld [vmem:[#allocation3 + $0xc] ss:$28 sps:$4 sm:$0xff]   ;;  %v3130_v5 = vld [vmem:[#allocation3] ss:$28 sps:$4 sm:$0xff]  }
  0x55   :  { %1371 = vmatpush1.bf16.msra.mxu0 %v2601_v28  ;;  %1329 = vmatprep.subr.bf16.mxu1 %v2602_v29  ;;  %v2638_v55 = vld [vmem:[#allocation5 + $0x1a4] ss:$16 sps:$4 sm:$0xff]   ;;  %v2642_v57 = vld [vmem:[#allocation5 + $0x1a0] ss:$16 sps:$4 sm:$0xff]   ;;  %v2695_v28 = vld [vmem:[#allocation5 + $0xa8] ss:$16 sps:$4 sm:$0xff]  }
  0x56   :  { %1372 = vmatprep.subr.bf16.mxu0 %v2604_v30  ;;  %1390 = vmatprep.mubr.bf16.mxu0 %v3127_v52  ;;  %v2640_v56 = vld [vmem:[#allocation5 + $0x3a4] ss:$16 sps:$4 sm:$0xff]   ;;  %v2643_v58 = vld [vmem:[#allocation5 + $0x3a0] ss:$16 sps:$4 sm:$0xff]   ;;  %v2703_v30 = vld [vmem:[#allocation5 + $0xcc] ss:$16 sps:$4 sm:$0xff]  }
  0x57   :  { %v2644_v59 = vld [vmem:[#allocation5 + $0x1c4] ss:$16 sps:$4 sm:$0xff]   ;;  %v2648_v61 = vld [vmem:[#allocation5 + $0x1c0] ss:$16 sps:$4 sm:$0xff]  }
  0x58   :  { %1330 = vmatpush1.bf16.msra.mxu1 %v2606_v31  ;;  %v2646_v60 = vld [vmem:[#allocation5 + $0x3c4] ss:$16 sps:$4 sm:$0xff]   ;;  %v2649_v62 = vld [vmem:[#allocation5 + $0x3c0] ss:$16 sps:$4 sm:$0xff]  }
  0x59   :  { %1373 = vmatpush1.bf16.msra.mxu0 %v2607_v32  ;;  %1331 = vmatprep.subr.bf16.mxu1 %v2608_v33  ;;  %v2650_v63 = vld [vmem:[#allocation5 + $0x1e4] ss:$16 sps:$4 sm:$0xff]   ;;  %v2654_v1 = vld [vmem:[#allocation5 + $0x1e0] ss:$16 sps:$4 sm:$0xff]   ;;  %v2701_v32 = vld [vmem:[#allocation5 + $0xc8] ss:$16 sps:$4 sm:$0xff]  }
  0x5a   :  { %1374 = vmatprep.subr.bf16.mxu0 %v2610_v34  ;;  %v2652_v0 = vld [vmem:[#allocation5 + $0x3e4] ss:$16 sps:$4 sm:$0xff]   ;;  %v2655_v2 = vld [vmem:[#allocation5 + $0x3e0] ss:$16 sps:$4 sm:$0xff]   ;;  %v2709_v34 = vld [vmem:[#allocation5 + $0xec] ss:$16 sps:$4 sm:$0xff]  }
  0x5b   :  { %v2664_v3 = vld [vmem:[#allocation5 + $0x404] ss:$16 sps:$4 sm:$0xff]   ;;  %v3132_v6 = vld [vmem:[#allocation3 + $0x8] ss:$28 sps:$4 sm:$0xff]  }
  0x5c   :  { %1332 = vmatpush1.bf16.msra.mxu1 %v2612_v35  ;;  %v2662_v7 = vld [vmem:[#allocation5 + $0x400] ss:$16 sps:$4 sm:$0xff]   ;;  %v2670_v9 = vld [vmem:[#allocation5 + $0x424] ss:$16 sps:$4 sm:$0xff]   ;;  %v3136_v35 = vld [vmem:[#allocation3 + $0x14] ss:$28 sps:$4 sm:$0xff]  }
  0x5d   :  { %1375 = vmatpush1.bf16.msra.mxu0 %v2613_v36  ;;  %1333 = vmatprep.subr.bf16.mxu1 %v2614_v37  ;;  %v2668_v11 = vld [vmem:[#allocation5 + $0x420] ss:$16 sps:$4 sm:$0xff]   ;;  %v2676_v13 = vld [vmem:[#allocation5 + $0x444] ss:$16 sps:$4 sm:$0xff]   ;;  %v2707_v37 = vld [vmem:[#allocation5 + $0xe8] ss:$16 sps:$4 sm:$0xff]  }
  0x5e   :  { %1376 = vmatprep.subr.bf16.mxu0 %v2616_v38  ;;  %v2674_v15 = vld [vmem:[#allocation5 + $0x440] ss:$16 sps:$4 sm:$0xff]   ;;  %v2682_v17 = vld [vmem:[#allocation5 + $0x464] ss:$16 sps:$4 sm:$0xff]  }
  0x5f   :  { %v2680_v19 = vld [vmem:[#allocation5 + $0x460] ss:$16 sps:$4 sm:$0xff]   ;;  %v2688_v21 = vld [vmem:[#allocation5 + $0x484] ss:$16 sps:$4 sm:$0xff]  }
  0x60   :  { %1334 = vmatpush1.bf16.msra.mxu1 %v2618_v39  ;;  %v2686_v23 = vld [vmem:[#allocation5 + $0x480] ss:$16 sps:$4 sm:$0xff]   ;;  %v2694_v25 = vld [vmem:[#allocation5 + $0x4a4] ss:$16 sps:$4 sm:$0xff]   ;;  %v2715_v39 = vld [vmem:[#allocation5 + $0x10c] ss:$16 sps:$4 sm:$0xff]  }
  0x61   :  { %1377 = vmatpush1.bf16.msra.mxu0 %v2619_v40  ;;  %1335 = vmatprep.subr.bf16.mxu1 %v2620_v41  ;;  %v2692_v27 = vld [vmem:[#allocation5 + $0x4a0] ss:$16 sps:$4 sm:$0xff]   ;;  %v2700_v29 = vld [vmem:[#allocation5 + $0x4c4] ss:$16 sps:$4 sm:$0xff]   ;;  %v2713_v41 = vld [vmem:[#allocation5 + $0x108] ss:$16 sps:$4 sm:$0xff]  }
  0x62   :  { %1378 = vmatprep.subr.bf16.mxu0 %v2622_v42  ;;  %v2698_v31 = vld [vmem:[#allocation5 + $0x4c0] ss:$16 sps:$4 sm:$0xff]   ;;  %v2706_v33 = vld [vmem:[#allocation5 + $0x4e4] ss:$16 sps:$4 sm:$0xff]  }
  0x63   :  { %v2704_v36 = vld [vmem:[#allocation5 + $0x4e0] ss:$16 sps:$4 sm:$0xff]   ;;  %v2712_v38 = vld [vmem:[#allocation5 + $0x504] ss:$16 sps:$4 sm:$0xff]  }
  0x64   :  { %1336 = vmatpush1.bf16.msra.mxu1 %v2624_v43  ;;  %v2710_v40 = vld [vmem:[#allocation5 + $0x500] ss:$16 sps:$4 sm:$0xff]   ;;  %v2718_v42 = vld [vmem:[#allocation5 + $0x524] ss:$16 sps:$4 sm:$0xff]   ;;  %v2721_v43 = vld [vmem:[#allocation5 + $0x12c] ss:$16 sps:$4 sm:$0xff]  }
  0x65   :  { %1379 = vmatpush1.bf16.msra.mxu0 %v2625_v44  ;;  %1337 = vmatprep.subr.bf16.mxu1 %v2626_v45  ;;  %v2716_v44 = vld [vmem:[#allocation5 + $0x520] ss:$16 sps:$4 sm:$0xff]   ;;  %v2719_v45 = vld [vmem:[#allocation5 + $0x128] ss:$16 sps:$4 sm:$0xff]  }
  0x66   :  { %1380 = vmatprep.subr.bf16.mxu0 %v2628_v46  ;;  %v2724_v46 = vld [vmem:[#allocation5 + $0x544] ss:$16 sps:$4 sm:$0xff]  }
  0x68   :  { %1338 = vmatpush1.bf16.msra.mxu1 %v2630_v47  ;;  %v2727_v47 = vld [vmem:[#allocation5 + $0x14c] ss:$16 sps:$4 sm:$0xff]  }
  0x69   :  { %1381 = vmatpush1.bf16.msra.mxu0 %v2631_v48  ;;  %1339 = vmatprep.subr.bf16.mxu1 %v2632_v49  ;;  %v2722_v48 = vld [vmem:[#allocation5 + $0x540] ss:$16 sps:$4 sm:$0xff]   ;;  %v2725_v49 = vld [vmem:[#allocation5 + $0x148] ss:$16 sps:$4 sm:$0xff]  }
  0x6a   :  { %1382 = vmatprep.subr.bf16.mxu0 %v2634_v51  ;;  %v2733_v51 = vld [vmem:[#allocation5 + $0x16c] ss:$16 sps:$4 sm:$0xff]  }
  0x6c   :  { %1340 = vmatpush1.bf16.msra.mxu1 %v2636_v53  ;;  %v2728_v53 = vld [vmem:[#allocation5 + $0x560] ss:$16 sps:$4 sm:$0xff]  }
  0x6d   :  { %1383 = vmatpush1.bf16.msra.mxu0 %v2637_v54  ;;  %1341 = vmatprep.subr.bf16.mxu1 %v2638_v55  ;;  %v2731_v54 = vld [vmem:[#allocation5 + $0x168] ss:$16 sps:$4 sm:$0xff]   ;;  %v2736_v55 = vld [vmem:[#allocation5 + $0x584] ss:$16 sps:$4 sm:$0xff]  }
  0x6e   :  { %1384 = vmatprep.subr.bf16.mxu0 %v2640_v56  ;;  %v2739_v56 = vld [vmem:[#allocation5 + $0x18c] ss:$16 sps:$4 sm:$0xff]  }
  0x70   :  { %1342 = vmatpush1.bf16.msra.mxu1 %v2642_v57  ;;  %v2734_v57 = vld [vmem:[#allocation5 + $0x580] ss:$16 sps:$4 sm:$0xff]  }
  0x71   :  { %1385 = vmatpush1.bf16.msra.mxu0 %v2643_v58  ;;  %1343 = vmatprep.subr.bf16.mxu1 %v2644_v59  ;;  %v2737_v58 = vld [vmem:[#allocation5 + $0x188] ss:$16 sps:$4 sm:$0xff]   ;;  %v2742_v59 = vld [vmem:[#allocation5 + $0x5a4] ss:$16 sps:$4 sm:$0xff]  }
  0x72   :  { %1386 = vmatprep.subr.bf16.mxu0 %v2646_v60  ;;  %v2745_v60 = vld [vmem:[#allocation5 + $0x1ac] ss:$16 sps:$4 sm:$0xff]  }
  0x74   :  { %1344 = vmatpush1.bf16.msra.mxu1 %v2648_v61  ;;  %v2740_v61 = vld [vmem:[#allocation5 + $0x5a0] ss:$16 sps:$4 sm:$0xff]  }
  0x75   :  { %1387 = vmatpush1.bf16.msra.mxu0 %v2649_v62  ;;  %1345 = vmatprep.subr.bf16.mxu1 %v2650_v63  ;;  %v2743_v62 = vld [vmem:[#allocation5 + $0x1a8] ss:$16 sps:$4 sm:$0xff]   ;;  %v2748_v63 = vld [vmem:[#allocation5 + $0x5c4] ss:$16 sps:$4 sm:$0xff]  }
  0x76   :  { %1388 = vmatprep.subr.bf16.mxu0 %v2652_v0  ;;  %v2751_v0 = vld [vmem:[#allocation5 + $0x1cc] ss:$16 sps:$4 sm:$0xff]  }
  0x78   :  { %1346 = vmatpush1.bf16.msra.mxu1 %v2654_v1  ;;  %v2746_v1 = vld [vmem:[#allocation5 + $0x5c0] ss:$16 sps:$4 sm:$0xff]  }
  0x79   :  { %1389 = vmatpush1.bf16.msra.mxu0 %v2655_v2  ;;  %1487 = vmatprep.subr.bf16.mxu1 %v2667_v4  ;;  %v2749_v2 = vld [vmem:[#allocation5 + $0x1c8] ss:$16 sps:$4 sm:$0xff]   ;;  %v2757_v4 = vld [vmem:[#allocation5 + $0x1ec] ss:$16 sps:$4 sm:$0xff]  }
  0x7a   :  { %1401 = vmatprep.subr.bf16.mxu0 %v2664_v3  ;;  %v2754_v3 = vld [vmem:[#allocation5 + $0x5e4] ss:$16 sps:$4 sm:$0xff]  }
  0x7b   :  { %1348 = vmatmul.mubr.bf16.vlgmr.msra.gmra.mrb[0].mxu1 %v3130_v5 }
  0x7c   :  { %1391 = vmatmul.mubr.bf16.vlgmr.msra.gmra.mrb[0].mxu0 %v3132_v6  ;;  %1488 = vmatpush1.bf16.msra.mxu1 %v2665_v8  ;;  %v2755_v8 = vld [vmem:[#allocation5 + $0x1e8] ss:$16 sps:$4 sm:$0xff]  }
  0x7d   :  { %1402 = vmatpush1.bf16.msra.mxu0 %v2662_v7  ;;  %1489 = vmatprep.subr.bf16.mxu1 %v2673_v10  ;;  %v2752_v7 = vld [vmem:[#allocation5 + $0x5e0] ss:$16 sps:$4 sm:$0xff]   ;;  %v2769_v10 = vld [vmem:[#allocation5 + $0x604] ss:$16 sps:$4 sm:$0xff]  }
  0x7e   :  { %1403 = vmatprep.subr.bf16.mxu0 %v2670_v9  ;;  %1519 = vmatprep.mubr.bf16.mxu1 %v2658_v50  ;;  %v2730_v50 = vld [vmem:[#allocation5 + $0x564] ss:$16 sps:$4 sm:$0xff]   ;;  %v2763_v9 = vld [vmem:[#allocation5 + $0x20c] ss:$16 sps:$4 sm:$0xff]  }
  0x7f   :  { %1433 = vmatprep.mubr.bf16.mxu0 %v3136_v35 }
  0x80   :  { %1490 = vmatpush1.bf16.msra.mxu1 %v2671_v12  ;;  %v2761_v12 = vld [vmem:[#allocation5 + $0x208] ss:$16 sps:$4 sm:$0xff]  }
  0x81   :  { %1404 = vmatpush1.bf16.msra.mxu0 %v2668_v11  ;;  %1491 = vmatprep.subr.bf16.mxu1 %v2679_v14  ;;  %v3139_v11 = vld [vmem:[#allocation3 + $0x10] ss:$28 sps:$4 sm:$0xff]   ;;  %v2766_v14 = vld [vmem:[#allocation5 + $0x22c] ss:$16 sps:$4 sm:$0xff]  }
  0x82   :  { %1405 = vmatprep.subr.bf16.mxu0 %v2676_v13  ;;  %v2767_v13 = vld [vmem:[#allocation5 + $0x600] ss:$16 sps:$4 sm:$0xff]  }
  0x84   :  { %1492 = vmatpush1.bf16.msra.mxu1 %v2677_v16  ;;  %v2772_v16 = vld [vmem:[#allocation5 + $0x24c] ss:$16 sps:$4 sm:$0xff]  }
  0x85   :  { %1406 = vmatpush1.bf16.msra.mxu0 %v2674_v15  ;;  %1493 = vmatprep.subr.bf16.mxu1 %v2685_v18  ;;  %v2764_v15 = vld [vmem:[#allocation5 + $0x228] ss:$16 sps:$4 sm:$0xff]  }
  0x86   :  { %1407 = vmatprep.subr.bf16.mxu0 %v2682_v17  ;;  %v3047_v17 = vmov 0   ;;  %v2770_v18 = vld [vmem:[#allocation5 + $0x248] ss:$16 sps:$4 sm:$0xff]  }
  0x88   :  { %1494 = vmatpush1.bf16.msra.mxu1 %v2683_v20  ;;  %v3145_v20 = vld [vmem:[#allocation3 + $0x18] ss:$28 sps:$4 sm:$0xff]  }
  0x89   :  { %1408 = vmatpush1.bf16.msra.mxu0 %v2680_v19  ;;  %1495 = vmatprep.subr.bf16.mxu1 %v2691_v22  ;;  %v2776_v19 = vld [vmem:[#allocation5 + $0x26c] ss:$16 sps:$4 sm:$0xff]  }
  0x8a   :  { %1409 = vmatprep.subr.bf16.mxu0 %v2688_v21  ;;  %v2774_v21 = vld [vmem:[#allocation5 + $0x268] ss:$16 sps:$4 sm:$0xff]   ;;  %v2779_v22 = vld [vmem:[#allocation5 + $0x28c] ss:$16 sps:$4 sm:$0xff]  }
  0x8c   :  { %1496 = vmatpush1.bf16.msra.mxu1 %v2689_v24  ;;  %v2780_v24 = vld [vmem:[#allocation5 + $0x2a8] ss:$16 sps:$4 sm:$0xff]  }
  0x8d   :  { %1410 = vmatpush1.bf16.msra.mxu0 %v2686_v23  ;;  %1497 = vmatprep.subr.bf16.mxu1 %v2697_v26  ;;  %v2782_v23 = vld [vmem:[#allocation5 + $0x2ac] ss:$16 sps:$4 sm:$0xff]  }
  0x8e   :  { %1411 = vmatprep.subr.bf16.mxu0 %v2694_v25  ;;  %v2783_v25 = vld [vmem:[#allocation5 + $0x2c8] ss:$16 sps:$4 sm:$0xff]   ;;  %v2788_v26 = vld [vmem:[#allocation5 + $0x2ec] ss:$16 sps:$4 sm:$0xff]  }
  0x90   :  { %1498 = vmatpush1.bf16.msra.mxu1 %v2695_v28  ;;  %v2866_v28 = vld [vmem:[#allocation7 + $0x4] ss:$8 sps:$4 sm:$0xff]  }
  0x91   :  { %1412 = vmatpush1.bf16.msra.mxu0 %v2692_v27  ;;  %1499 = vmatprep.subr.bf16.mxu1 %v2703_v30  ;;  %v2864_v27 = vld [vmem:[#allocation7] ss:$8 sps:$4 sm:$0xff]  }
  0x92   :  { %1413 = vmatprep.subr.bf16.mxu0 %v2700_v29  ;;  %v2869_v29 = vld [vmem:[#allocation7 + $0x14] ss:$8 sps:$4 sm:$0xff]   ;;  %v2786_v30 = vld [vmem:[#allocation5 + $0x2e8] ss:$16 sps:$4 sm:$0xff]  }
  0x94   :  { %1500 = vmatpush1.bf16.msra.mxu1 %v2701_v32  ;;  %v2867_v32 = vld [vmem:[#allocation7 + $0x10] ss:$8 sps:$4 sm:$0xff]  }
  0x95   :  { %1414 = vmatpush1.bf16.msra.mxu0 %v2698_v31  ;;  %1501 = vmatprep.subr.bf16.mxu1 %v2709_v34  ;;  %v2791_v31 = vld [vmem:[#allocation5 + $0x30c] ss:$16 sps:$4 sm:$0xff]   ;;  %v2789_v34 = vld [vmem:[#allocation5 + $0x308] ss:$16 sps:$4 sm:$0xff]  }
  0x96   :  { %1415 = vmatprep.subr.bf16.mxu0 %v2706_v33  ;;  %v2872_v33 = vld [vmem:[#allocation7 + $0x24] ss:$8 sps:$4 sm:$0xff]  }
  0x98   :  { %1502 = vmatpush1.bf16.msra.mxu1 %v2707_v37  ;;  %v2870_v37 = vld [vmem:[#allocation7 + $0x20] ss:$8 sps:$4 sm:$0xff]  }
  0x99   :  { %1416 = vmatpush1.bf16.msra.mxu0 %v2704_v36  ;;  %1503 = vmatprep.subr.bf16.mxu1 %v2715_v39  ;;  %v2794_v36 = vld [vmem:[#allocation5 + $0x32c] ss:$16 sps:$4 sm:$0xff]  }
  0x9a   :  { %1417 = vmatprep.subr.bf16.mxu0 %v2712_v38  ;;  %v2792_v38 = vld [vmem:[#allocation5 + $0x328] ss:$16 sps:$4 sm:$0xff]   ;;  %v2875_v39 = vld [vmem:[#allocation7 + $0x34] ss:$8 sps:$4 sm:$0xff]  }
  0x9c   :  { %1504 = vmatpush1.bf16.msra.mxu1 %v2713_v41  ;;  %v2873_v41 = vld [vmem:[#allocation7 + $0x30] ss:$8 sps:$4 sm:$0xff]  }
  0x9d   :  { %1418 = vmatpush1.bf16.msra.mxu0 %v2710_v40  ;;  %1505 = vmatprep.subr.bf16.mxu1 %v2721_v43  ;;  %v2797_v40 = vld [vmem:[#allocation5 + $0x34c] ss:$16 sps:$4 sm:$0xff]   ;;  %v2795_v43 = vld [vmem:[#allocation5 + $0x348] ss:$16 sps:$4 sm:$0xff]  }
  0x9e   :  { %1419 = vmatprep.subr.bf16.mxu0 %v2718_v42  ;;  %v2878_v42 = vld [vmem:[#allocation7 + $0x44] ss:$8 sps:$4 sm:$0xff]  }
  0xa0   :  { %1506 = vmatpush1.bf16.msra.mxu1 %v2719_v45  ;;  %v2876_v45 = vld [vmem:[#allocation7 + $0x40] ss:$8 sps:$4 sm:$0xff]  }
  0xa1   :  { %1420 = vmatpush1.bf16.msra.mxu0 %v2716_v44  ;;  %1507 = vmatprep.subr.bf16.mxu1 %v2727_v47  ;;  %v2800_v44 = vld [vmem:[#allocation5 + $0x36c] ss:$16 sps:$4 sm:$0xff]   ;;  %v2798_v47 = vld [vmem:[#allocation5 + $0x368] ss:$16 sps:$4 sm:$0xff]  }
  0xa2   :  { %1421 = vmatprep.subr.bf16.mxu0 %v2724_v46  ;;  %v2881_v46 = vld [vmem:[#allocation7 + $0x54] ss:$8 sps:$4 sm:$0xff]  }
  0xa4   :  { %1508 = vmatpush1.bf16.msra.mxu1 %v2725_v49  ;;  %v2879_v49 = vld [vmem:[#allocation7 + $0x50] ss:$8 sps:$4 sm:$0xff]  }
  0xa5   :  { %1422 = vmatpush1.bf16.msra.mxu0 %v2722_v48  ;;  %1509 = vmatprep.subr.bf16.mxu1 %v2733_v51  ;;  %v2803_v48 = vld [vmem:[#allocation5 + $0x38c] ss:$16 sps:$4 sm:$0xff]   ;;  %v2801_v51 = vld [vmem:[#allocation5 + $0x388] ss:$16 sps:$4 sm:$0xff]  }
  0xa6   :  { %1423 = vmatprep.subr.bf16.mxu0 %v2730_v50  ;;  %v2884_v50 = vld [vmem:[#allocation7 + $0x64] ss:$8 sps:$4 sm:$0xff]  }
  0xa8   :  { %1510 = vmatpush1.bf16.msra.mxu1 %v2731_v54  ;;  %v2882_v54 = vld [vmem:[#allocation7 + $0x60] ss:$8 sps:$4 sm:$0xff]  }
  0xa9   :  { %1424 = vmatpush1.bf16.msra.mxu0 %v2728_v53  ;;  %1511 = vmatprep.subr.bf16.mxu1 %v2739_v56  ;;  %v2806_v53 = vld [vmem:[#allocation5 + $0x3ac] ss:$16 sps:$4 sm:$0xff]   ;;  %v2804_v56 = vld [vmem:[#allocation5 + $0x3a8] ss:$16 sps:$4 sm:$0xff]  }
  0xaa   :  { %1425 = vmatprep.subr.bf16.mxu0 %v2736_v55  ;;  %v2887_v55 = vld [vmem:[#allocation7 + $0x74] ss:$8 sps:$4 sm:$0xff]  }
  0xac   :  { %1512 = vmatpush1.bf16.msra.mxu1 %v2737_v58  ;;  %v2885_v58 = vld [vmem:[#allocation7 + $0x70] ss:$8 sps:$4 sm:$0xff]  }
  0xad   :  { %1426 = vmatpush1.bf16.msra.mxu0 %v2734_v57  ;;  %1513 = vmatprep.subr.bf16.mxu1 %v2745_v60  ;;  %v2809_v57 = vld [vmem:[#allocation5 + $0x3cc] ss:$16 sps:$4 sm:$0xff]   ;;  %v2807_v60 = vld [vmem:[#allocation5 + $0x3c8] ss:$16 sps:$4 sm:$0xff]  }
  0xae   :  { %1427 = vmatprep.subr.bf16.mxu0 %v2742_v59  ;;  %v2890_v59 = vld [vmem:[#allocation7 + $0x84] ss:$8 sps:$4 sm:$0xff]  }
  0xb0   :  { %1514 = vmatpush1.bf16.msra.mxu1 %v2743_v62  ;;  %v2888_v62 = vld [vmem:[#allocation7 + $0x80] ss:$8 sps:$4 sm:$0xff]  }
  0xb1   :  { %1428 = vmatpush1.bf16.msra.mxu0 %v2740_v61  ;;  %1515 = vmatprep.subr.bf16.mxu1 %v2751_v0  ;;  %v2812_v61 = vld [vmem:[#allocation5 + $0x3ec] ss:$16 sps:$4 sm:$0xff]   ;;  %v2810_v0 = vld [vmem:[#allocation5 + $0x3e8] ss:$16 sps:$4 sm:$0xff]  }
  0xb2   :  { %1429 = vmatprep.subr.bf16.mxu0 %v2748_v63  ;;  %v2893_v63 = vld [vmem:[#allocation7 + $0x94] ss:$8 sps:$4 sm:$0xff]  }
  0xb4   :  { %1516 = vmatpush1.bf16.msra.mxu1 %v2749_v2  ;;  %v2891_v2 = vld [vmem:[#allocation7 + $0x90] ss:$8 sps:$4 sm:$0xff]  }
  0xb5   :  { %1430 = vmatpush1.bf16.msra.mxu0 %v2746_v1  ;;  %1517 = vmatprep.subr.bf16.mxu1 %v2757_v4  ;;  %v2815_v1 = vld [vmem:[#allocation5 + $0x40c] ss:$16 sps:$4 sm:$0xff]   ;;  %v2813_v4 = vld [vmem:[#allocation5 + $0x408] ss:$16 sps:$4 sm:$0xff]  }
  0xb6   :  { %1431 = vmatprep.subr.bf16.mxu0 %v2754_v3  ;;  %v2896_v3 = vld [vmem:[#allocation7 + $0xa4] ss:$8 sps:$4 sm:$0xff]  }
  0xb8   :  { %1518 = vmatpush1.bf16.msra.mxu1 %v2755_v8  ;;  %v2894_v8 = vld [vmem:[#allocation7 + $0xa0] ss:$8 sps:$4 sm:$0xff]  }
  0xb9   :  { %1432 = vmatpush1.bf16.msra.mxu0 %v2752_v7  ;;  %1530 = vmatprep.subr.bf16.mxu1 %v2763_v9  ;;  %v2818_v7 = vld [vmem:[#allocation5 + $0x42c] ss:$16 sps:$4 sm:$0xff]  }
  0xba   :  { %1444 = vmatprep.subr.bf16.mxu0 %v2769_v10  ;;  %v2899_v9 = vld [vmem:[#allocation7 + $0xb4] ss:$8 sps:$4 sm:$0xff]   ;;  %v2816_v10 = vld [vmem:[#allocation5 + $0x428] ss:$16 sps:$4 sm:$0xff]  }
  0xbb   :  { %1520 = vmatmul.mubr.bf16.vlgmr.msra.gmra.mrb[4].mxu1 %v3130_v5  ;;  %v2777_v5 = vld [vmem:[#allocation5 + $0x288] ss:$16 sps:$4 sm:$0xff]  }
  0xbc   :  { %1434 = vmatmul.mubr.bf16.vlgmr.msra.gmra.mrb[0].mxu0 %v3139_v11  ;;  %1531 = vmatpush1.bf16.msra.mxu1 %v2761_v12  ;;  %v2821_v12 = vld [vmem:[#allocation5 + $0x44c] ss:$16 sps:$4 sm:$0xff]  }
  0xbd   :  { %1445 = vmatpush1.bf16.msra.mxu0 %v2767_v13  ;;  %1532 = vmatprep.subr.bf16.mxu1 %v2766_v14  ;;  %v2897_v13 = vld [vmem:[#allocation7 + $0xb0] ss:$8 sps:$4 sm:$0xff]   ;;  %v2902_v14 = vld [vmem:[#allocation7 + $0xc4] ss:$8 sps:$4 sm:$0xff]  }
  0xbe   :  { %1476 = vmatprep.mubr.bf16.mxu0 %v3047_v17  ;;  %1562 = vmatprep.mubr.bf16.mxu1 %v3127_v52  ;;  %v2785_v52 = vld [vmem:[#allocation5 + $0x2cc] ss:$16 sps:$4 sm:$0xff]  }
  0xbf   :  { %2083 = vmatprep.subr.bf16.mxu0 %v2866_v28  ;;  %v2842_v28 = vld [vmem:[#allocation5 + $0x52c] ss:$16 sps:$4 sm:$0xff]  }
  0xc0   :  { %1533 = vmatpush1.bf16.msra.mxu1 %v2764_v15  ;;  %v2819_v15 = vld [vmem:[#allocation5 + $0x448] ss:$16 sps:$4 sm:$0xff]  }
  0xc1   :  { %1534 = vmatprep.subr.bf16.mxu1 %v2772_v16  ;;  %v2824_v16 = vld [vmem:[#allocation5 + $0x46c] ss:$16 sps:$4 sm:$0xff]  }
  0xc4   :  { %1535 = vmatpush1.bf16.msra.mxu1 %v2770_v18  ;;  %v2900_v18 = vld [vmem:[#allocation7 + $0xc0] ss:$8 sps:$4 sm:$0xff]  }
  0xc5   :  { %1536 = vmatprep.subr.bf16.mxu1 %v2776_v19  ;;  %v2822_v19 = vld [vmem:[#allocation5 + $0x468] ss:$16 sps:$4 sm:$0xff]  }
  0xc8   :  { %2443 = vmatmul.mubr.msk.bf16.vlgmr.msra.gmra.mrb[0].mxu0 %vm1311_vm0, %v3145_v20  ;;  %1537 = vmatpush1.bf16.msra.mxu1 %v2774_v21  ;;  %v2830_v21 = vld [vmem:[#allocation5 + $0x4ac] ss:$16 sps:$4 sm:$0xff]  }
  0xc9   :  { %1538 = vmatprep.subr.bf16.mxu1 %v2779_v22  ;;  %2084 = vmatpush1.bf16.msra.mxu0 %v2864_v27  ;;  %v2828_v22 = vld [vmem:[#allocation5 + $0x4a8] ss:$16 sps:$4 sm:$0xff]   ;;  %v2905_v27 = vld [vmem:[#allocation7 + $0xd4] ss:$8 sps:$4 sm:$0xff]  }
  0xca   :  { %2085 = vmatprep.subr.bf16.mxu0 %v2869_v29  ;;  %v2903_v29 = vld [vmem:[#allocation7 + $0xd0] ss:$8 sps:$4 sm:$0xff]  }
  0xcc   :  { %1539 = vmatpush1.bf16.msra.mxu1 %v2777_v5  ;;  %v2833_v5 = vld [vmem:[#allocation5 + $0x4cc] ss:$16 sps:$4 sm:$0xff]  }
  0xcd   :  { %1540 = vmatprep.subr.bf16.mxu1 %v2782_v23  ;;  %2086 = vmatpush1.bf16.msra.mxu0 %v2867_v32  ;;  %v2831_v23 = vld [vmem:[#allocation5 + $0x4c8] ss:$16 sps:$4 sm:$0xff]   ;;  %v2845_v32 = vld [vmem:[#allocation5 + $0x54c] ss:$16 sps:$4 sm:$0xff]  }
  0xce   :  { %2087 = vmatprep.subr.bf16.mxu0 %v2872_v33  ;;  %v2906_v33 = vld [vmem:[#allocation7 + $0xe0] ss:$8 sps:$4 sm:$0xff]  }
  0xd0   :  { %1541 = vmatpush1.bf16.msra.mxu1 %v2780_v24  ;;  %v2836_v24 = vld [vmem:[#allocation5 + $0x4ec] ss:$16 sps:$4 sm:$0xff]  }
  0xd1   :  { %1542 = vmatprep.subr.bf16.mxu1 %v2785_v52  ;;  %2088 = vmatpush1.bf16.msra.mxu0 %v2870_v37  ;;  %v2834_v52 = vld [vmem:[#allocation5 + $0x4e8] ss:$16 sps:$4 sm:$0xff]   ;;  %v2848_v37 = vld [vmem:[#allocation5 + $0x56c] ss:$16 sps:$4 sm:$0xff]  }
  0xd2   :  { %2089 = vmatprep.subr.bf16.mxu0 %v2875_v39  ;;  %v2846_v39 = vld [vmem:[#allocation5 + $0x568] ss:$16 sps:$4 sm:$0xff]  }
  0xd4   :  { %1543 = vmatpush1.bf16.msra.mxu1 %v2783_v25  ;;  %v2839_v25 = vld [vmem:[#allocation5 + $0x50c] ss:$16 sps:$4 sm:$0xff]  }
  0xd5   :  { %1544 = vmatprep.subr.bf16.mxu1 %v2788_v26  ;;  %2090 = vmatpush1.bf16.msra.mxu0 %v2873_v41  ;;  %v2837_v26 = vld [vmem:[#allocation5 + $0x508] ss:$16 sps:$4 sm:$0xff]   ;;  %v2914_v41 = vld [vmem:[#allocation7 + $0x104] ss:$8 sps:$4 sm:$0xff]  }
  0xd6   :  { %2091 = vmatprep.subr.bf16.mxu0 %v2878_v42  ;;  %v2849_v42 = vld [vmem:[#allocation5 + $0x588] ss:$16 sps:$4 sm:$0xff]  }
  0xd8   :  { %1545 = vmatpush1.bf16.msra.mxu1 %v2786_v30  ;;  %v2840_v30 = vld [vmem:[#allocation5 + $0x528] ss:$16 sps:$4 sm:$0xff]  }
  0xd9   :  { %1546 = vmatprep.subr.bf16.mxu1 %v2791_v31  ;;  %2092 = vmatpush1.bf16.msra.mxu0 %v2876_v45  ;;  %v2908_v31 = vld [vmem:[#allocation7 + $0xe4] ss:$8 sps:$4 sm:$0xff]  }
  0xda   :  { %2093 = vmatprep.subr.bf16.mxu0 %v2881_v46  ;;  %v2857_v45 = vld [vmem:[#allocation5 + $0x5cc] ss:$16 sps:$4 sm:$0xff]   ;;  %v2855_v46 = vld [vmem:[#allocation5 + $0x5c8] ss:$16 sps:$4 sm:$0xff]  }
  0xdc   :  { %1547 = vmatpush1.bf16.msra.mxu1 %v2789_v34  ;;  %v2843_v34 = vld [vmem:[#allocation5 + $0x548] ss:$16 sps:$4 sm:$0xff]  }
  0xdd   :  { %1548 = vmatprep.subr.bf16.mxu1 %v2794_v36  ;;  %2094 = vmatpush1.bf16.msra.mxu0 %v2879_v49  ;;  %v2911_v36 = vld [vmem:[#allocation7 + $0xf4] ss:$8 sps:$4 sm:$0xff]  }
  0xde   :  { %2095 = vmatprep.subr.bf16.mxu0 %v2884_v50  ;;  %v2863_v49 = vld [vmem:[#allocation5 + $0x60c] ss:$16 sps:$4 sm:$0xff]   ;;  %v2861_v50 = vld [vmem:[#allocation5 + $0x608] ss:$16 sps:$4 sm:$0xff]  }
  0xe0   :  { %1549 = vmatpush1.bf16.msra.mxu1 %v2792_v38  ;;  %v2909_v38 = vld [vmem:[#allocation7 + $0xf0] ss:$8 sps:$4 sm:$0xff]  }
  0xe1   :  { %1550 = vmatprep.subr.bf16.mxu1 %v2797_v40  ;;  %2096 = vmatpush1.bf16.msra.mxu0 %v2882_v54  ;;  %v2851_v40 = vld [vmem:[#allocation5 + $0x58c] ss:$16 sps:$4 sm:$0xff]  }
  0xe2   :  { %2097 = vmatprep.subr.bf16.mxu0 %v2887_v55 }
  0xe4   :  { %1551 = vmatpush1.bf16.msra.mxu1 %v2795_v43  ;;  %v2854_v43 = vld [vmem:[#allocation5 + $0x5ac] ss:$16 sps:$4 sm:$0xff]  }
  0xe5   :  { %1552 = vmatprep.subr.bf16.mxu1 %v2800_v44  ;;  %2098 = vmatpush1.bf16.msra.mxu0 %v2885_v58  ;;  %v2852_v44 = vld [vmem:[#allocation5 + $0x5a8] ss:$16 sps:$4 sm:$0xff]  }
  0xe6   :  { %2099 = vmatprep.subr.bf16.mxu0 %v2890_v59 }
  0xe8   :  { %1553 = vmatpush1.bf16.msra.mxu1 %v2798_v47  ;;  %v2860_v47 = vld [vmem:[#allocation5 + $0x5ec] ss:$16 sps:$4 sm:$0xff]  }
  0xe9   :  { %1554 = vmatprep.subr.bf16.mxu1 %v2803_v48  ;;  %2100 = vmatpush1.bf16.msra.mxu0 %v2888_v62  ;;  %v2858_v48 = vld [vmem:[#allocation5 + $0x5e8] ss:$16 sps:$4 sm:$0xff]  }
  0xea   :  { %2101 = vmatprep.subr.bf16.mxu0 %v2893_v63 }
  0xec   :  { %1555 = vmatpush1.bf16.msra.mxu1 %v2801_v51 }
  0xed   :  { %1556 = vmatprep.subr.bf16.mxu1 %v2806_v53  ;;  %2102 = vmatpush1.bf16.msra.mxu0 %v2891_v2 }
  0xee   :  { %2103 = vmatprep.subr.bf16.mxu0 %v2896_v3 }
  0xf0   :  { %1557 = vmatpush1.bf16.msra.mxu1 %v2804_v56  ;;  %v276_v56 = vlaneseq }
  0xf1   :  { %1558 = vmatprep.subr.bf16.mxu1 %v2809_v57  ;;  %2104 = vmatpush1.bf16.msra.mxu0 %v2894_v8 }
  0xf2   :  { %2105 = vmatprep.subr.bf16.mxu0 %v2899_v9  ;;  %v3155_v57 = vshrl.u32 %v276_v56, 7 }
  0xf4   :  { %1559 = vmatpush1.bf16.msra.mxu1 %v2807_v60  ;;  %v3158_v58 = vsub.s32 0, %v3155_v57 }
  0xf5   :  { %1560 = vmatprep.subr.bf16.mxu1 %v2812_v61  ;;  %2106 = vmatpush1.bf16.msra.mxu0 %v2897_v13 }
  0xf6   :  { %2107 = vmatprep.subr.bf16.mxu0 %v2902_v14 }
  0xf8   :  { %1561 = vmatpush1.bf16.msra.mxu1 %v2810_v0 }
  0xf9   :  { %1573 = vmatprep.subr.bf16.mxu1 %v2815_v1  ;;  %2108 = vmatpush1.bf16.msra.mxu0 %v2900_v18 }
  0xfa   :  { %2109 = vmatprep.subr.bf16.mxu0 %v2905_v27  ;;  %v2924_v27 = vld [vmem:[#allocation7 + $0x140] ss:$8 sps:$4 sm:$0xff]  }
  0xfb   :  { %1563 = vmatmul.mubr.bf16.vlgmr.msra.gmra.mrb[4].mxu1 %v3132_v6  ;;  %v2827_v6 = vld [vmem:[#allocation5 + $0x48c] ss:$16 sps:$4 sm:$0xff]  }
  0xfc   :  { %1574 = vmatpush1.bf16.msra.mxu1 %v2813_v4  ;;  %1605 = vmatprep.mubr.bf16.mxu1 %v3136_v35  ;;  %v2825_v35 = vld [vmem:[#allocation5 + $0x488] ss:$16 sps:$4 sm:$0xff]  }
  0xfd   :  { %1575 = vmatprep.subr.bf16.mxu1 %v2818_v7  ;;  %2110 = vmatpush1.bf16.msra.mxu0 %v2903_v29  ;;  %v2927_v29 = vld [vmem:[#allocation7 + $0x150] ss:$8 sps:$4 sm:$0xff]  }
  0xfe   :  { %2111 = vmatprep.subr.bf16.mxu0 %v2908_v31  ;;  %v2930_v31 = vld [vmem:[#allocation7 + $0x160] ss:$8 sps:$4 sm:$0xff]  }
 0x100   :  { %1576 = vmatpush1.bf16.msra.mxu1 %v2816_v10 }
 0x101   :  { %1577 = vmatprep.subr.bf16.mxu1 %v2821_v12  ;;  %2112 = vmatpush1.bf16.msra.mxu0 %v2906_v33  ;;  %v2933_v33 = vld [vmem:[#allocation7 + $0x170] ss:$8 sps:$4 sm:$0xff]  }
 0x102   :  { %2113 = vmatprep.subr.bf16.mxu0 %v2911_v36  ;;  %v2936_v36 = vld [vmem:[#allocation7 + $0x180] ss:$8 sps:$4 sm:$0xff]  }
 0x104   :  { %1578 = vmatpush1.bf16.msra.mxu1 %v2819_v15 }
 0x105   :  { %1579 = vmatprep.subr.bf16.mxu1 %v2824_v16  ;;  %2114 = vmatpush1.bf16.msra.mxu0 %v2909_v38  ;;  %v2939_v38 = vld [vmem:[#allocation7 + $0x190] ss:$8 sps:$4 sm:$0xff]  }
 0x106   :  { %2126 = vmatprep.subr.bf16.mxu0 %v2914_v41  ;;  %v2947_v41 = vld [vmem:[#allocation7 + $0x1b4] ss:$8 sps:$4 sm:$0xff]  }
 0x108   :  { %1580 = vmatpush1.bf16.msra.mxu1 %v2822_v19 }
 0x109   :  { %1581 = vmatprep.subr.bf16.mxu1 %v2827_v6 }
 0x10c   :  { %1582 = vmatpush1.bf16.msra.mxu1 %v2825_v35 }
 0x10d   :  { %1583 = vmatprep.subr.bf16.mxu1 %v2830_v21  ;;  %v2912_v21 = vld [vmem:[#allocation7 + $0x100] ss:$8 sps:$4 sm:$0xff]  }
 0x110   :  { %1584 = vmatpush1.bf16.msra.mxu1 %v2828_v22  ;;  %v2917_v22 = vld [vmem:[#allocation7 + $0x114] ss:$8 sps:$4 sm:$0xff]  }
 0x111   :  { %1585 = vmatprep.subr.bf16.mxu1 %v2833_v5  ;;  %v2915_v5 = vld [vmem:[#allocation7 + $0x110] ss:$8 sps:$4 sm:$0xff]  }
 0x114   :  { %1586 = vmatpush1.bf16.msra.mxu1 %v2831_v23  ;;  %v2920_v23 = vld [vmem:[#allocation7 + $0x124] ss:$8 sps:$4 sm:$0xff]  }
 0x115   :  { %1587 = vmatprep.subr.bf16.mxu1 %v2836_v24  ;;  %v2918_v24 = vld [vmem:[#allocation7 + $0x120] ss:$8 sps:$4 sm:$0xff]  }
 0x118   :  { %1588 = vmatpush1.bf16.msra.mxu1 %v2834_v52  ;;  %v2923_v52 = vld [vmem:[#allocation7 + $0x134] ss:$8 sps:$4 sm:$0xff]  }
 0x119   :  { %1589 = vmatprep.subr.bf16.mxu1 %v2839_v25  ;;  %v2921_v25 = vld [vmem:[#allocation7 + $0x130] ss:$8 sps:$4 sm:$0xff]  }
 0x11c   :  { %1590 = vmatpush1.bf16.msra.mxu1 %v2837_v26  ;;  %v2926_v26 = vld [vmem:[#allocation7 + $0x144] ss:$8 sps:$4 sm:$0xff]  }
 0x11d   :  { %1591 = vmatprep.subr.bf16.mxu1 %v2842_v28  ;;  %v2929_v28 = vld [vmem:[#allocation7 + $0x154] ss:$8 sps:$4 sm:$0xff]  }
 0x120   :  { %1592 = vmatpush1.bf16.msra.mxu1 %v2840_v30  ;;  %v2932_v30 = vld [vmem:[#allocation7 + $0x164] ss:$8 sps:$4 sm:$0xff]  }
 0x121   :  { %1593 = vmatprep.subr.bf16.mxu1 %v2845_v32  ;;  %v2935_v32 = vld [vmem:[#allocation7 + $0x174] ss:$8 sps:$4 sm:$0xff]  }
 0x124   :  { %1594 = vmatpush1.bf16.msra.mxu1 %v2843_v34  ;;  %v2938_v34 = vld [vmem:[#allocation7 + $0x184] ss:$8 sps:$4 sm:$0xff]  }
 0x125   :  { %1595 = vmatprep.subr.bf16.mxu1 %v2848_v37  ;;  %v2941_v37 = vld [vmem:[#allocation7 + $0x194] ss:$8 sps:$4 sm:$0xff]  }
 0x128   :  { %1596 = vmatpush1.bf16.msra.mxu1 %v2846_v39  ;;  %v2944_v39 = vld [vmem:[#allocation7 + $0x1a4] ss:$8 sps:$4 sm:$0xff]  }
 0x129   :  { %1597 = vmatprep.subr.bf16.mxu1 %v2851_v40  ;;  %v2942_v40 = vld [vmem:[#allocation7 + $0x1a0] ss:$8 sps:$4 sm:$0xff]  }
 0x12c   :  { %1598 = vmatpush1.bf16.msra.mxu1 %v2849_v42  ;;  %v2945_v42 = vld [vmem:[#allocation7 + $0x1b0] ss:$8 sps:$4 sm:$0xff]  }
 0x12d   :  { %1599 = vmatprep.subr.bf16.mxu1 %v2854_v43  ;;  %v2950_v43 = vld [vmem:[#allocation7 + $0x1c4] ss:$8 sps:$4 sm:$0xff]  }
 0x130   :  { %1600 = vmatpush1.bf16.msra.mxu1 %v2852_v44  ;;  %v2948_v44 = vld [vmem:[#allocation7 + $0x1c0] ss:$8 sps:$4 sm:$0xff]  }
 0x131   :  { %1601 = vmatprep.subr.bf16.mxu1 %v2857_v45  ;;  %v2953_v45 = vld [vmem:[#allocation7 + $0x1d4] ss:$8 sps:$4 sm:$0xff]  }
 0x134   :  { %1602 = vmatpush1.bf16.msra.mxu1 %v2855_v46  ;;  %v2951_v46 = vld [vmem:[#allocation7 + $0x1d0] ss:$8 sps:$4 sm:$0xff]  }
 0x135   :  { %1603 = vmatprep.subr.bf16.mxu1 %v2860_v47  ;;  %v2956_v47 = vld [vmem:[#allocation7 + $0x1e4] ss:$8 sps:$4 sm:$0xff]  }
 0x138   :  { %1604 = vmatpush1.bf16.msra.mxu1 %v2858_v48  ;;  %v2954_v48 = vld [vmem:[#allocation7 + $0x1e0] ss:$8 sps:$4 sm:$0xff]  }
 0x139   :  { %1616 = vmatprep.subr.bf16.mxu1 %v2863_v49  ;;  %v2959_v49 = vld [vmem:[#allocation7 + $0x1f4] ss:$8 sps:$4 sm:$0xff]  }
 0x13b   :  { %1606 = vmatmul.mubr.bf16.vlgmr.msra.gmra.mrb[4].mxu1 %v3139_v11  ;;  %v3163_v11 = vld [vmem:[%s3195_s2] sm:$0xf] }
 0x13c   :  { %1617 = vmatpush1.bf16.msra.mxu1 %v2861_v50  ;;  %1648 = vmatprep.mubr.bf16.mxu1 %v3047_v17  ;;  %v282_v17 = vsub.s32 1, %v3155_v57  ;;  %v2957_v50 = vld [vmem:[#allocation7 + $0x1f0] ss:$8 sps:$4 sm:$0xff]  }
 0x13e   :  { %v283_v59 = vrot.slane %v3163_v11, %v282_v17 }
 0x147   :  { %2444 = vmatmul.mubr.msk.bf16.vlgmr.msra.gmra.mrb[4].mxu1 %vm1311_vm0, %v3145_v20  ;;  %v279_v20 = vrot.slane %v3163_v11, %v3158_v58 }
 0x14e   :  { %v1349_v51 = vpop.f32.mrb[0].mxu1 }
 0x14f   :  { %v1351_v53 = vpop.f32.mrb[1].mxu1  ;;  %v1350_v60 = vadd.f32 %v1349_v51, %v279_v20  ;;  %v286_v51 = vsub.s32 2, %v3155_v57 }
 0x150   :  { %v1353_v54 = vpop.f32.mrb[2].mxu1  ;;  %v1352_v61 = vadd.f32 %v1351_v53, %v283_v59  ;;  %v290_v53 = vsub.s32 3, %v3155_v57 }
 0x151   :  { %v1355_v55 = vpop.f32.mrb[3].mxu1  ;;  %v1354_v63 = vadd.f32 %v1353_v54, %v279_v20  ;;  %v287_v54 = vrot.slane %v3163_v11, %v286_v51 }
 0x152   :  { %v1356_v2 = vadd.f32 %v1355_v55, %v283_v59  ;;  %v291_v55 = vrot.slane %v3163_v11, %v290_v53 }
 0x19b   :  { %v1478_v62 = vpop.f32.mrb[0].mxu0 }
 0x19c   :  { %v2511_v0 = vadd.f32 %v1478_v62, %v1350_v60  ;;  %v1480_v1 = vpop.f32.mrb[1].mxu0 }
 0x19d   :  { %v2513_v3 = vadd.f32 %v1480_v1, %v1352_v61  ;;  %v1482_v4 = vpop.f32.mrb[2].mxu0 }
 0x19e   :  { %v1667_v7 = vmul.f32 0.01, %v2511_v0  ;;  %v2515_v8 = vadd.f32 %v1482_v4, %v1354_v63  ;;  %v1484_v9 = vpop.f32.mrb[3].mxu0  ;;  %vm1659_vm1 = vcmp.gt.f32.partialorder %v2511_v0, 0.0 }
 0x19f   :  { %v1668_v10 = vmul.f32 0.01, %v2513_v3  ;;  %v2517_v12 = vadd.f32 %v1484_v9, %v1356_v2  ;;  %vm1660_vm2 = vcmp.gt.f32.partialorder %v2513_v3, 0.0 }
 0x1a0   :  { %vm1663_vm3 = vcmp.gt.f32.partialorder %v2515_v8, 0.0  ;;  %v1671_v13 = vmul.f32 0.01, %v2515_v8  ;;  %v1675_v15 = vsel %vm1659_vm1, %v2511_v0, %v1667_v7 }
 0x1a1   :  { %vm1664_vm4 = vcmp.gt.f32.partialorder %v2517_v12, 0.0  ;;  %v1672_v14 = vmul.f32 0.01, %v2517_v12  ;;  %v1676_v19 = vsel %vm1660_vm2, %v2513_v3, %v1668_v10 }
 0x1a2   :  { %v1679_v16 = vsel %vm1663_vm3, %v2515_v8, %v1671_v13  ;;  %v2181_v13 = vld [vmem:[%s3198_s5] sm:$0x3] }
 0x1a3   :  { %v1683_v18 = vpack.c.bf16 %v1679_v16, %v1675_v15  ;;  %v1680_v6 = vsel %vm1664_vm4, %v2517_v12, %v1672_v14  ;;  %v1751_v14 = vld [vmem:[%s3197_s4] sm:$0x3]  ;;  %v2182_v15 = vunpack.c.l.bf16 %v2181_v13 }
 0x1a4   :  { %v1684_v35 = vpack.c.bf16 %v1680_v6, %v1676_v19  ;;  %v1756_v16 = vrot.slane %v1751_v14, %v3158_v58 }
 0x1a5   :  { %v2187_v19 = vrot.slane %v2182_v15, %v3158_v58  ;;  %v2191_v6 = vrot.slane %v2182_v15, %v286_v51 }
 0x1a6   :  { %2115 = vmatprep.mubr.bf16.mxu0 %v1684_v35 }
 0x1a7   :  { %2116 = vmatmul.mubr.bf16.vlgmr.msra.gmra.mrb[4].mxu0 %v1683_v18  ;;  %v1760_v18 = vrot.slane %v1751_v14, %v282_v17 }
 0x1a8   :  { %2127 = vmatpush1.bf16.msra.mxu0 %v2912_v21 }
 0x1a9   :  { %2128 = vmatprep.subr.bf16.mxu0 %v2917_v22 }
 0x1ac   :  { %2129 = vmatpush1.bf16.msra.mxu0 %v2915_v5 }
 0x1ad   :  { %2130 = vmatprep.subr.bf16.mxu0 %v2920_v23 }
 0x1b0   :  { %2131 = vmatpush1.bf16.msra.mxu0 %v2918_v24  ;;  %v2197_v24 = vrot.slane %v2187_v19, %v3158_v58 }
 0x1b1   :  { %2132 = vmatprep.subr.bf16.mxu0 %v2923_v52 }
 0x1b4   :  { %2133 = vmatpush1.bf16.msra.mxu0 %v2921_v25 }
 0x1b5   :  { %2134 = vmatprep.subr.bf16.mxu0 %v2926_v26 }
 0x1b8   :  { %2135 = vmatpush1.bf16.msra.mxu0 %v2924_v27  ;;  %v2201_v27 = vrot.slane %v2191_v6, %v3158_v58  ;;  %v2509_v58 = vld [vmem:[#allocation2] ss:$0 sm:$0xff] }
 0x1b9   :  { %2136 = vmatprep.subr.bf16.mxu0 %v2929_v28 }
 0x1bc   :  { %2137 = vmatpush1.bf16.msra.mxu0 %v2927_v29 }
 0x1bd   :  { %2138 = vmatprep.subr.bf16.mxu0 %v2932_v30 }
 0x1c0   :  { %2139 = vmatpush1.bf16.msra.mxu0 %v2930_v31 }
 0x1c1   :  { %2140 = vmatprep.subr.bf16.mxu0 %v2935_v32 }
 0x1c4   :  { %2141 = vmatpush1.bf16.msra.mxu0 %v2933_v33 }
 0x1c5   :  { %2142 = vmatprep.subr.bf16.mxu0 %v2938_v34 }
 0x1c8   :  { %2143 = vmatpush1.bf16.msra.mxu0 %v2936_v36 }
 0x1c9   :  { %2144 = vmatprep.subr.bf16.mxu0 %v2941_v37 }
 0x1cc   :  { %2145 = vmatpush1.bf16.msra.mxu0 %v2939_v38 }
 0x1cd   :  { %2146 = vmatprep.subr.bf16.mxu0 %v2944_v39 }
 0x1d0   :  { %2147 = vmatpush1.bf16.msra.mxu0 %v2942_v40 }
 0x1d1   :  { %2148 = vmatprep.subr.bf16.mxu0 %v2947_v41 }
 0x1d4   :  { %2149 = vmatpush1.bf16.msra.mxu0 %v2945_v42 }
 0x1d5   :  { %2150 = vmatprep.subr.bf16.mxu0 %v2950_v43 }
 0x1d8   :  { %2151 = vmatpush1.bf16.msra.mxu0 %v2948_v44 }
 0x1d9   :  { %2152 = vmatprep.subr.bf16.mxu0 %v2953_v45 }
 0x1dc   :  { %2153 = vmatpush1.bf16.msra.mxu0 %v2951_v46 }
 0x1dd   :  { %2154 = vmatprep.subr.bf16.mxu0 %v2956_v47 }
 0x1e0   :  { %2155 = vmatpush1.bf16.msra.mxu0 %v2954_v48 }
 0x1e1   :  { %2156 = vmatprep.subr.bf16.mxu0 %v2959_v49 }
 0x1e4   :  { %2157 = vmatpush1.bf16.msra.mxu0 %v2957_v50 }
 0x21a   :  { %v1650_v56 = vpop.f32.mrb[4].mxu1 }
 0x21b   :  { %v2518_v20 = vadd.f32 %v1650_v56, %v287_v54  ;;  %v1652_v59 = vpop.f32.mrb[5].mxu1 }
 0x21c   :  { %v2519_v60 = vadd.f32 %v1652_v59, %v291_v55  ;;  %v1654_v61 = vpop.f32.mrb[6].mxu1 }
 0x21d   :  { %v1669_v62 = vmul.f32 0.01, %v2518_v20  ;;  %v2520_v63 = vadd.f32 %v1654_v61, %v287_v54  ;;  %v1656_v0 = vpop.f32.mrb[7].mxu1  ;;  %vm1661_vm5 = vcmp.gt.f32.partialorder %v2518_v20, 0.0 }
 0x21e   :  { %v1670_v1 = vmul.f32 0.01, %v2519_v60  ;;  %v2521_v2 = vadd.f32 %v1656_v0, %v291_v55  ;;  %vm1662_vm6 = vcmp.gt.f32.partialorder %v2519_v60, 0.0 }
 0x21f   :  { %vm1665_vm7 = vcmp.gt.f32.partialorder %v2520_v63, 0.0  ;;  %v1673_v3 = vmul.f32 0.01, %v2520_v63  ;;  %v1677_v7 = vsel %vm1661_vm5, %v2518_v20, %v1669_v62 }
 0x220   :  { %vm1666_vm8 = vcmp.gt.f32.partialorder %v2521_v2, 0.0  ;;  %v1674_v4 = vmul.f32 0.01, %v2521_v2  ;;  %v1678_v11 = vsel %vm1662_vm6, %v2519_v60, %v1670_v1 }
 0x221   :  { %v1681_v8 = vsel %vm1665_vm7, %v2520_v63, %v1673_v3 }
 0x222   :  { %v1685_v9 = vpack.c.bf16 %v1681_v8, %v1677_v7  ;;  %v1682_v10 = vsel %vm1666_vm8, %v2521_v2, %v1674_v4 }
 0x223   :  { %v1686_v12 = vpack.c.bf16 %v1682_v10, %v1678_v11 }
 0x225   :  { %2158 = vmatprep.mubr.bf16.mxu0 %v1686_v12 }
 0x226   :  { %2159 = vmatmul.mubr.bf16.vlgmr.msra.gmra.mrb[4].mxu0 %v1685_v9 }
 0x2f9   :  { %v2160_v35 = vpop.f32.mrb[4].mxu0 }
 0x2fa   :  { %v2522_v21 = vadd.f32 %v2160_v35, %v1756_v16  ;;  %v2162_v22 = vpop.f32.mrb[5].mxu0 }
 0x2fb   :  { %v2523_v5 = vadd.f32 %v2162_v22, %v1760_v18  ;;  %v2164_v23 = vpop.f32.mrb[6].mxu0 }
 0x2fc   :  { %vm2169_vm9 = vcmp.gt.f32.partialorder %v2522_v21, 0.0  ;;  %v2173_v52 = vmul.f32 0.01, %v2522_v21  ;;  %v2524_v25 = vadd.f32 %v2164_v23, %v1756_v16  ;;  %v2166_v26 = vpop.f32.mrb[7].mxu0 }
 0x2fd   :  { %vm2170_vm10 = vcmp.gt.f32.partialorder %v2523_v5, 0.0  ;;  %v2174_v28 = vmul.f32 0.01, %v2523_v5  ;;  %v2525_v57 = vadd.f32 %v2166_v26, %v1760_v18 }
 0x2fe   :  { %vm2171_vm11 = vcmp.gt.f32.partialorder %v2524_v25, 0.0  ;;  %v2175_v17 = vmul.f32 0.01, %v2524_v25  ;;  %v2177_v29 = vsel %vm2169_vm9, %v2522_v21, %v2173_v52 }
 0x2ff   :  { %vm2172_vm12 = vcmp.gt.f32.partialorder %v2525_v57, 0.0  ;;  %v2176_v30 = vmul.f32 0.01, %v2525_v57  ;;  %v2178_v31 = vsel %vm2170_vm10, %v2523_v5, %v2174_v28  ;;  %v2202_v32 = vmul.f32 %v2197_v24, %v2177_v29 }
 0x300   :  { %v2203_v33 = vmul.f32 %v2201_v27, %v2178_v31  ;;  %v2179_v34 = vsel %vm2171_vm11, %v2524_v25, %v2175_v17 }
 0x301   :  { %v2180_v36 = vsel %vm2172_vm12, %v2525_v57, %v2176_v30  ;;  %v2204_v37 = vmul.f32 %v2197_v24, %v2179_v34 }
 0x302   :  { %v2206_v38 = vadd.f32 %v2203_v33, %v2202_v32  ;;  %v2205_v39 = vmul.f32 %v2201_v27, %v2180_v36 }
 0x304   :  { %2207 = vadd.xlane.f32.xlu0 %v2206_v38  ;;  %v2209_v40 = vadd.f32 %v2205_v39, %v2204_v37 }
 0x308   :  { %2210 = vadd.xlane.f32.xlu0 %v2209_v40 }
 0x391   :  { %v2208_v41 = vpop.xlane.xlu0 %2207 }
 0x392   :  { %v2219_v42 = vadd.f32 %v2509_v58, %v2208_v41 }
 0x394   :  { %v2221_v43 = vsub.f32 0.0, %v2219_v42 }
 0x395   :  { %v2211_v44 = vpop.xlane.xlu0 %2210 }
 0x396   :  { %v2223_v45 = vmul.f32 1.442695, %v2221_v43  ;;  %v2220_v46 = vadd.f32 %v2509_v58, %v2211_v44 }
 0x398   :  { %2960 = vpow2.f32 %v2223_v45  ;;  %v2222_v47 = vsub.f32 0.0, %v2220_v46 }
 0x39a   :  { %v2225_v48 = vmul.f32 1.442695, %v2222_v47 }
 0x39c   :  { %2962 = vpow2.f32 %v2225_v48 }
 0x3a2   :  { %v2961_v49 = vpop.eup %2960 }
 0x3a3   :  { %v2227_v50 = vadd.f32 1.0, %v2961_v49 }
 0x3a5   :  { %2964 = vrcp.f32 %v2227_v50 }
 0x3a6   :  { %v2963_v51 = vpop.eup %2962 }
 0x3a7   :  { %v2228_v53 = vadd.f32 1.0, %v2963_v51 }
 0x3a9   :  { %2966 = vrcp.f32 %v2228_v53 }
 0x3af   :  { %v2965_v54 = vpop.eup %2964 }
 0x3b0   :  { %2232 = vst.msk [vmem:[%s3200_s7] sm:$0xff] %vm2231_vm13, %v2965_v54 }
 0x3b3   :  { %v2967_v55 = vpop.eup %2966 }
 0x3b4   :  { %2233 = vst.msk [vmem:[%s3200_s7 + $0x8] sm:$0xff] %vm2231_vm13, %v2967_v55 }
 0x3b5   :  { %2238 = vsyncpa [#allocation4], 1 }
 0x3b6   :  { %2239 = vsyncpa [#allocation6], 1 }

</bundles_post_ra>
